<compile_context>
chip_gen: v7x
topology: tpu7x:2x2x1
jax: 0.10.0
libtpu: 0.0.40
codegen_flags: <defaults>
</compile_context>

<pallas_src>
import jax
import jax.numpy as jnp
from jax import lax
from jax.experimental import pallas as pl
from jax.experimental.pallas import tpu as pltpu

OPENAI_CLIP_MEAN = (0.48145466, 0.4578275, 0.40821073)
OPENAI_CLIP_STD = (0.26862954, 0.26130258, 0.27577711)
LOGIT_SCALE = 100.0   # exp(learned logit_scale) in CLIP, ~100 at convergence
LANE = 128            # TPU lane width; prompt-pair axis zero-padded to this
E_PAD = 128           # embedding dim zero-padded to one full lane vreg
TB_MAX = 256          # batch-tile cap (see header: v5e 256 / v6e+v7x 512)


# ----------------------------------------------------------------------------
# Pallas kernel: fully fused CLIPIQA forward
#   raw image rows -> (pool+norm+embed+proj folded) matmul -> L2 normalize
#   -> logit-difference matmul -> sigmoid  (== pairwise softmax "good" prob)
# ----------------------------------------------------------------------------
def clipiqa_head_kernel(xf_ref, w_ref, b_ref, tdiff_ref, o_ref):
    # xf_ref:    (TB, K)       raw flattened NCHW image rows, K = C*H*W
    # w_ref:     (K, E_PAD)    norm + patch-embed + global-pool + projection
    # b_ref:     (1, E_PAD)    folded bias
    # tdiff_ref: (E_PAD, LANE) logit-scaled (good - bad) text features
    # o_ref:     (TB, LANE)    per-pair "good" probability (lane-dense store)
    feat = jnp.dot(xf_ref[...], w_ref[...],
                   preferred_element_type=jnp.float32) + b_ref[...]  # (TB, E_PAD)

    # L2-normalize image features (padded columns are exactly zero).  Epsilon
    # only guards the all-zero padded batch rows; it is ~1e-12 vs feat^2 ~ O(1)
    # so real rows stay well inside the 1e-4 verification tolerance.
    inv_norm = lax.rsqrt(jnp.sum(feat * feat, axis=-1, keepdims=True) + 1e-12)
    feat_n = feat * inv_norm                                          # (TB, E_PAD)

    # softmax([lg, lb])[0] == sigmoid(lg - lb); one MXU matmul against the
    # pre-scaled difference text features gives all prompt pairs at once.
    # exp overflow at |ldiff| ~ 200 saturates cleanly to 0/1 (no NaN).
    ldiff = jnp.dot(feat_n, tdiff_ref[...],
                    preferred_element_type=jnp.float32)               # (TB, LANE)
    o_ref[...] = 1.0 / (1.0 + jnp.exp(-ldiff))


# ----------------------------------------------------------------------------
# Parameter construction with full folding (pool / norm / embed / proj / scale)
# ----------------------------------------------------------------------------
def _round_up(n, m):
    return -(-n // m) * m


def build_params(key, *, C=3, H=16, W=16, patch=8, D=64, E=32,
                 n_prompts=10, vocab=64, seq=8, tok_dim=48):
    """Deterministic synthetic CLIP-like parameters (raw + kernel-fused)."""
    assert H % patch == 0 and W % patch == 0, "H, W must be multiples of patch"
    assert E <= E_PAD and n_prompts % 2 == 0 and n_prompts // 2 <= LANE
    k1, k2, k3, k4 = jax.random.split(key, 4)
    Din = C * patch * patch
    hp, wp = H // patch, W // patch

    w_patch = 0.05 * jax.random.normal(k1, (Din, D), jnp.float32)
    b_patch = 0.01 * jax.random.normal(k2, (1, D), jnp.float32)
    w_proj = 0.1 * jax.random.normal(k3, (D, E), jnp.float32)

    # --- synthetic text tower for the fixed CLIPIQA antonym prompt pairs ---
    token_ids = (jnp.arange(n_prompts * seq, dtype=jnp.int32) * 7 + 3) % vocab
    token_ids = token_ids.reshape(n_prompts, seq)
    emb_table = 0.02 * jax.random.normal(k4, (vocab, tok_dim), jnp.float32)
    w_text = 0.1 * jax.random.normal(jax.random.fold_in(k4, 1),
                                     (tok_dim, E), jnp.float32)
    txt = emb_table[token_ids].mean(axis=1) @ w_text          # (n_prompts, E)
    txt_n = txt / jnp.linalg.norm(txt, axis=-1, keepdims=True)

    # per-element (channel-major patch layout) CLIP mean / inv-std vectors
    mean_vec = jnp.repeat(jnp.asarray(OPENAI_CLIP_MEAN, jnp.float32),
                          patch * patch).reshape(1, Din)
    inv_std_vec = 1.0 / jnp.repeat(jnp.asarray(OPENAI_CLIP_STD, jnp.float32),
                                   patch * patch).reshape(1, Din)

    # fold norm + patch-embed + projection:
    #   mean(xW+b) = mean(x)W + b   and   ((x-m)/s)Wf = x(Wf/s) - (m/s)Wf
    w_fused = w_patch @ w_proj                                # (Din, E)
    b_fused = b_patch @ w_proj                                # (1, E)
    w_fold = inv_std_vec.reshape(Din, 1) * w_fused            # (Din, E)
    b_fold = b_fused - (mean_vec * inv_std_vec) @ w_fused     # (1, E)

    # zero-pad E -> E_PAD (exact: padded feat columns are identically zero)
    w_fold_p = jnp.zeros((Din, E_PAD), jnp.float32).at[:, :E].set(w_fold)
    b_fold_p = jnp.zeros((1, E_PAD), jnp.float32).at[:, :E].set(b_fold)

    # fold the GLOBAL AVERAGE POOL: duplicate each per-Din-element weight row
    # over the (hp, wp) patch grid (and divide by Np), so the kernel contracts
    # the raw flattened NCHW image directly.  Row order below matches the
    # row-major flatten of (c, h, w) with h = hy*patch+py, w = wy*patch+px.
    w3 = w_fold_p.reshape(C, patch, patch, E_PAD)
    w_big = jnp.broadcast_to(w3[:, None, :, None, :, :],
                             (C, hp, patch, wp, patch, E_PAD))
    w_big = w_big.reshape(C * H * W, E_PAD) / float(hp * wp)  # (C*H*W, E_PAD)

    # single logit-difference text matrix (softmax pair -> sigmoid(lg - lb)),
    # logit_scale folded in, zero-padded to a full (E_PAD, LANE) slab.
    n_pair = n_prompts // 2
    tdiff = (LOGIT_SCALE * (txt_n[0::2] - txt_n[1::2])).T      # (E, n_pair)
    tdiff_p = jnp.zeros((E_PAD, LANE), jnp.float32).at[:E, :n_pair].set(tdiff)

    return dict(patch=patch, n_pair=n_pair, C=C, H=H, W=W,
                w_big=w_big, b_fold=b_fold_p, tdiff=tdiff_p,
                # raw params kept only for the pure-JAX reference
                w_patch=w_patch, b_patch=b_patch, w_proj=w_proj, txt_n=txt_n)


# ----------------------------------------------------------------------------
# Wrapper: one pallas_call over the whole (sublane-padded) batch
# ----------------------------------------------------------------------------
def clipiqa_forward(x, params):
    """x: (B, 3, H, W) float32 NCHW in [0, 1]. Returns (B, 1) quality score."""
    B, C, H, W = x.shape
    assert (C, H, W) == (params["C"], params["H"], params["W"]), \
        "image shape must match the folded weights"
    K = C * H * W
    n_pair = params["n_pair"]

    # Free row-major merge (bitcast) -- the pool lives inside w_big, so the raw
    # image feeds the kernel directly: no pooled intermediate, no separate XLA
    # reduce kernel, one HBM read of the pixels.
    xf = x.reshape(B, K).astype(jnp.float32)

    # Sublane-pad the batch and pick the tile (see TB_MAX note in the header).
    b_pad = _round_up(B, 8)
    tb = min(b_pad, TB_MAX)
    b_pad = _round_up(b_pad, tb)
    if b_pad != B:
        xf = jnp.zeros((b_pad, K), jnp.float32).at[:B].set(xf)

    out = pl.pallas_call(
        clipiqa_head_kernel,
        out_shape=jax.ShapeDtypeStruct((b_pad, LANE), jnp.float32),
        grid=(b_pad // tb,),
        in_specs=[
            pl.BlockSpec((tb, K), lambda i: (i, 0)),         # raw image rows
            pl.BlockSpec((K, E_PAD), lambda i: (0, 0)),      # fused weight
            pl.BlockSpec((1, E_PAD), lambda i: (0, 0)),      # fused bias
            pl.BlockSpec((E_PAD, LANE), lambda i: (0, 0)),   # text logit-diff
        ],
        out_specs=pl.BlockSpec((tb, LANE), lambda i: (i, 0)),
        compiler_params=pltpu.CompilerParams(
            dimension_semantics=("parallel",)),
    )(xf, params["w_big"], params["b_fold"], params["tdiff"])

    # Tiny mean over the prompt pairs on the lane-dense output slab.
    return out[:B, :n_pair].mean(axis=1, keepdims=True)


# ----------------------------------------------------------------------------
# Pure-JAX reference mirroring the PyTorch CLIPIQA.forward semantics
# ----------------------------------------------------------------------------
def patchify_nchw(x, patch):
    """(B, C, H, W) -> (B, Np, C*patch*patch), channel-major patch flatten."""
    B, C, H, W = x.shape
    hp, wp = H // patch, W // patch
    x = x.reshape(B, C, hp, patch, wp, patch)
    x = x.transpose(0, 2, 4, 1, 3, 5)                 # (B, hp, wp, C, P, P)
    return x.reshape(B, hp * wp, C * patch * patch)


def clipiqa_reference(x, params):
    mean = jnp.asarray(OPENAI_CLIP_MEAN, jnp.float32).reshape(1, 3, 1, 1)
    std = jnp.asarray(OPENAI_CLIP_STD, jnp.float32).reshape(1, 3, 1, 1)
    xn = (x - mean) / std
    patches = patchify_nchw(xn, params["patch"])
    h = patches @ params["w_patch"] + params["b_patch"]
    pooled = h.mean(axis=1)
    feat = pooled @ params["w_proj"]
    feat_n = feat / jnp.linalg.norm(feat, axis=-1, keepdims=True)
    logits_per_image = LOGIT_SCALE * feat_n @ params["txt_n"].T   # (B, n_prompts)
    probs = jax.nn.softmax(
        logits_per_image.reshape(logits_per_image.shape[0], -1, 2), axis=-1)
    return probs[..., 0].mean(axis=1, keepdims=True)              # (B, 1)


if __name__ == "__main__":
    key = jax.random.PRNGKey(0)
    k_img, k_par = jax.random.split(key)

    B, C, H, W = 2, 3, 16, 16
    x = jax.random.uniform(k_img, (B, C, H, W), jnp.float32)      # image in [0,1]

    params = build_params(k_par, C=C, H=H, W=W, patch=8, D=64, E=32)

    out = jax.block_until_ready(clipiqa_forward(x, params))
    ref = jax.block_until_ready(clipiqa_reference(x, params))

    assert out.shape == (B, 1), out.shape
    assert jnp.allclose(out, ref, atol=1e-4, rtol=1e-4), (out, ref)

    print("KERNEL_OK")
</pallas_src>

<mosaic_0001>
module attributes {stable_mosaic.version = 11 : i64} {
  func.func @clipiqa_head_kernel(%arg0: i32, %arg1: memref<8x768xf32, #tpu.memory_space<vmem>>, %arg2: memref<768x128xf32, #tpu.memory_space<vmem>>, %arg3: memref<1x128xf32, #tpu.memory_space<vmem>>, %arg4: memref<128x128xf32, #tpu.memory_space<vmem>>, %arg5: memref<8x128xf32, #tpu.memory_space<vmem>>) attributes {dimension_semantics = [#tpu.dimension_semantics<parallel>], iteration_bounds = array<i64: 1>, scalar_prefetch = 0 : i64, scratch_operands = 0 : i64, tpu.core_type = #tpu.core_type<tc>, window_params = [{transform_indices = @transform_0, window_bounds = array<i64: 8, 768>}, {pipeline_mode = #tpu.pipeline_mode<synchronous>, transform_indices = @transform_1, window_bounds = array<i64: 768, 128>}, {pipeline_mode = #tpu.pipeline_mode<synchronous>, transform_indices = @transform_2, window_bounds = array<i64: 1, 128>}, {pipeline_mode = #tpu.pipeline_mode<synchronous>, transform_indices = @transform_3, window_bounds = array<i64: 128, 128>}, {transform_indices = @transform_4, window_bounds = array<i64: 8, 128>}]} {
    %c0 = arith.constant 0 : index
    %c0_0 = arith.constant 0 : index
    %0 = vector.load %arg1[%c0, %c0_0] : memref<8x768xf32, #tpu.memory_space<vmem>>, vector<8x768xf32>
    %c0_1 = arith.constant 0 : index
    %c0_2 = arith.constant 0 : index
    %1 = vector.load %arg2[%c0_1, %c0_2] : memref<768x128xf32, #tpu.memory_space<vmem>>, vector<768x128xf32>
    %cst = arith.constant dense<0.000000e+00> : vector<8x128xf32>
    %2 = tpu.matmul %0, %1, %cst {dimension_numbers = #tpu.dot_dimension_numbers<[1], [0], [0], [1], [0, 0, 1, 1], [], []>} : vector<8x768xf32>, vector<768x128xf32>, vector<8x128xf32> -> vector<8x128xf32>
    %c0_3 = arith.constant 0 : index
    %c0_4 = arith.constant 0 : index
    %3 = vector.load %arg3[%c0_3, %c0_4] : memref<1x128xf32, #tpu.memory_space<vmem>>, vector<1x128xf32>
    %4 = vector.broadcast %3 : vector<1x128xf32> to vector<8x128xf32>
    %5 = arith.addf %2, %4 : vector<8x128xf32>
    %6 = arith.mulf %5, %5 : vector<8x128xf32>
    %cst_5 = arith.constant dense<0.000000e+00> : vector<8xf32>
    %7 = vector.multi_reduction <add>, %6, %cst_5 [1] : vector<8x128xf32> to vector<8xf32>
    %8 = vector.shape_cast %7 : vector<8xf32> to vector<8x1xf32>
    %cst_6 = arith.constant 9.99999996E-13 : f32
    %9 = vector.broadcast %cst_6 : f32 to vector<8x1xf32>
    %10 = arith.addf %8, %9 : vector<8x1xf32>
    %11 = math.rsqrt %10 : vector<8x1xf32>
    %12 = vector.broadcast %11 : vector<8x1xf32> to vector<8x128xf32>
    %13 = arith.mulf %5, %12 : vector<8x128xf32>
    %c0_7 = arith.constant 0 : index
    %c0_8 = arith.constant 0 : index
    %14 = vector.load %arg4[%c0_7, %c0_8] : memref<128x128xf32, #tpu.memory_space<vmem>>, vector<128x128xf32>
    %cst_9 = arith.constant dense<0.000000e+00> : vector<8x128xf32>
    %15 = tpu.matmul %13, %14, %cst_9 {dimension_numbers = #tpu.dot_dimension_numbers<[1], [0], [0], [1], [0, 0, 1, 1], [], []>} : vector<8x128xf32>, vector<128x128xf32>, vector<8x128xf32> -> vector<8x128xf32>
    %cst_10 = arith.constant 0.000000e+00 : f32
    %16 = vector.broadcast %cst_10 : f32 to vector<8x128xf32>
    %17 = arith.subf %16, %15 : vector<8x128xf32>
    %18 = math.exp %17 : vector<8x128xf32>
    %cst_11 = arith.constant 1.000000e+00 : f32
    %19 = vector.broadcast %cst_11 : f32 to vector<8x128xf32>
    %20 = arith.addf %19, %18 : vector<8x128xf32>
    %cst_12 = arith.constant 1.000000e+00 : f32
    %21 = vector.broadcast %cst_12 : f32 to vector<8x128xf32>
    %22 = arith.divf %21, %20 : vector<8x128xf32>
    %c0_13 = arith.constant 0 : index
    %c0_14 = arith.constant 0 : index
    %23 = vector.load %arg5[%c0_13, %c0_14] : memref<8x128xf32, #tpu.memory_space<vmem>>, vector<8x128xf32>
    tpu.vector_store %arg5[%c0_13, %c0_14], %22 {strides = array<i32>} : memref<8x128xf32, #tpu.memory_space<vmem>>, vector<8x128xf32>,
    return
  }
  func.func @transform_0(%arg0: i32) -> (i32, i32) {
    %c0_i32 = arith.constant 0 : i32
    %c0_i32_0 = arith.constant 0 : i32
    return %arg0, %c0_i32 : i32, i32
  }
  func.func @transform_1(%arg0: i32) -> (i32, i32) {
    %c0_i32 = arith.constant 0 : i32
    %c0_i32_0 = arith.constant 0 : i32
    %c0_i32_1 = arith.constant 0 : i32
    return %c0_i32, %c0_i32_0 : i32, i32
  }
  func.func @transform_2(%arg0: i32) -> (i32, i32) {
    %c0_i32 = arith.constant 0 : i32
    %c0_i32_0 = arith.constant 0 : i32
    %c0_i32_1 = arith.constant 0 : i32
    return %c0_i32, %c0_i32_0 : i32, i32
  }
  func.func @transform_3(%arg0: i32) -> (i32, i32) {
    %c0_i32 = arith.constant 0 : i32
    %c0_i32_0 = arith.constant 0 : i32
    %c0_i32_1 = arith.constant 0 : i32
    return %c0_i32, %c0_i32_0 : i32, i32
  }
  func.func @transform_4(%arg0: i32) -> (i32, i32) {
    %c0_i32 = arith.constant 0 : i32
    %c0_i32_0 = arith.constant 0 : i32
    return %arg0, %c0_i32 : i32, i32
  }
}

</mosaic_0001>

<bundles_post_ra>
// kernel: tpu_custom_call.1
= control target key start
LH: loop header
LB: loop body
LE: loop exit
PB: predicated region body
PF: predicated region fallthrough
CT: control target
= control target key end

     0   :  { %9 = vsyncpa [#allocation3], 0  ;;  %s969_s0 = inlined_call_operand.hbm [shape: f32[8,768], index: 0, kind: input, shape index: {}]   ;;  %s970_s1 = inlined_call_operand.hbm [shape: f32[768,128], index: 1, kind: input, shape index: {}]   ;;  %s971_s2 = inlined_call_operand.vmem [shape: f32[1,128], index: 2, kind: input, shape index: {}]   ;;  %s972_s3 = inlined_call_operand.hbm [shape: f32[128,128], index: 3, kind: input, shape index: {}]   ;;  %s973_s4 = inlined_call_operand.hbm [shape: f32[8,128], index: 4, kind: output, shape index: {}]  }
   0x1   :  { %10 = vsyncpa [#allocation6], 0 }
   0x2   :  { %11 = vsyncpa [#allocation4], 0  ;;  %s878_s15 = smov [#allocation5]   ;;  %s784_s19 = scalar_lea.hbm %s970_s1, 12288 }
   0x3   :  { %s27_s16 = sshll.u32 %s878_s15, 4  ;;  %p785_p0 = scmp.ne.s32.totalorder %s970_s1, %s784_s19  ;;  %s28_s16 = int_to_ptr.vmem [resolvable:$true] %s27_s16 }
   0x4   :  { %p788_p1 = scmp.lt.u32.totalorder %s784_s19, %s970_s1 }
   0x6   :  { %p790_p2 = pnand %p788_p1, %p785_p0 }
   0x8   :  { %793 = shalt.err (!%p790_p2)
}
   0x9   :  { %s794_s24 = scalar_lea.vmem %s28_s16, 12288  ;;  %p799_p4 = scmp.lt.s32.totalorder %s28_s16, %s28_s16 }
   0xa   :  { %p795_p3 = scmp.ne.s32.totalorder %s28_s16, %s794_s24  ;;  %p800_p5 = scmp.lt.s32.totalorder %s794_s24, %s794_s24 }
   0xc   :  { %p801_p6 = por %p800_p5, %p799_p4 }
   0xe   :  { %p802_p7 = pnand %p801_p6, %p795_p3 }
  0x10   :  { %805 = shalt.err (!%p802_p7)
}
  0x11   :  { %s879_s25 = smov 128   ;;  %s880_s26 = smov 8  }
  0x12   :  { %33 = dma.hbm_to_vmem [thread:$0]  %s970_s1, 12288, %s28_s16, [#allocation6], %s879_s25, %s879_s25, %s880_s26  }
  0x13   :  { %s881_s29 = smov [#allocation2]   ;;  %s882_s5 = smov [#allocation7]  }
  0x14   :  { %s18_s30 = sshll.u32 %s881_s29, 4  ;;  %s41_s6 = sshll.u32 %s882_s5, 4  ;;  %s19_s30 = int_to_ptr.vmem [resolvable:$true] %s18_s30  ;;  %s42_s6 = int_to_ptr.vmem [resolvable:$true] %s41_s6 }
  0x15   :  { %s806_s9 = scalar_lea.hbm %s969_s0, 768 }
  0x16   :  { %p807_p8 = scmp.ne.s32.totalorder %s969_s0, %s806_s9  ;;  %p810_p9 = scmp.lt.u32.totalorder %s806_s9, %s969_s0 }
  0x18   :  { %p812_p10 = pnand %p810_p9, %p807_p8 }
  0x1a   :  { %815 = shalt.err (!%p812_p10)
}
  0x1b   :  { %s816_s1 = scalar_lea.vmem %s19_s30, 768  ;;  %p821_p12 = scmp.lt.s32.totalorder %s19_s30, %s19_s30 }
  0x1c   :  { %p817_p11 = scmp.ne.s32.totalorder %s19_s30, %s816_s1  ;;  %p822_p13 = scmp.lt.s32.totalorder %s816_s1, %s816_s1 }
  0x1e   :  { %p823_p0 = por %p822_p13, %p821_p12 }
  0x20   :  { %p824_p1 = pnand %p823_p0, %p817_p11 }
  0x22   :  { %827 = shalt.err (!%p824_p1)
}
  0x23   :  { %21 = dma.hbm_to_vmem [thread:$0]  %s969_s0, 768, %s19_s30, [#allocation3]  }
  0x24   :  { %s828_s18 = scalar_lea.hbm %s972_s3, 2048 }
  0x25   :  { %p829_p2 = scmp.ne.s32.totalorder %s972_s3, %s828_s18  ;;  %p832_p3 = scmp.lt.u32.totalorder %s828_s18, %s972_s3 }
  0x27   :  { %p834_p4 = pnand %p832_p3, %p829_p2 }
  0x29   :  { %837 = shalt.err (!%p834_p4)
}
  0x2a   :  { %s838_s23 = scalar_lea.vmem %s42_s6, 2048  ;;  %p843_p6 = scmp.lt.s32.totalorder %s42_s6, %s42_s6 }
  0x2b   :  { %p839_p5 = scmp.ne.s32.totalorder %s42_s6, %s838_s23  ;;  %p844_p7 = scmp.lt.s32.totalorder %s838_s23, %s838_s23 }
  0x2d   :  { %p845_p8 = por %p844_p7, %p843_p6 }
  0x2f   :  { %p846_p9 = pnand %p845_p8, %p839_p5 }
  0x31   :  { %849 = shalt.err (!%p846_p9)
}
  0x32   :  { %47 = dma.hbm_to_vmem [thread:$0]  %s972_s3, 2048, %s42_s6, [#allocation6], %s879_s25, %s879_s25, %s880_s26  }
  0x33   :  { %872 = dma.done.wait [#allocation3], 768  }
  0x34   :  { %873 = vsyncadd [#allocation3], 4294966528 }
  0x35   :  { %874 = dma.done.wait [#allocation6], 14336  }
  0x36   :  { %875 = vsyncadd [#allocation6], 4294952960  ;;  %v79_v0 = vld [vmem:[#allocation5 + $0x80] sm:$0xff]  ;;  %v80_v1 = vld [vmem:[#allocation5 + $0x88] sm:$0xff]  ;;  %vm884_vm0 = vmmov 0  }
  0x37   :  { %v63_v2 = vld [vmem:[#allocation5] sm:$0xff]  ;;  %v649_v3 = vpack.c.bf16 %v80_v1, %v79_v0  ;;  %v64_v4 = vld [vmem:[#allocation5 + $0x8] sm:$0xff]  ;;  %v81_v11 = vld [vmem:[#allocation5 + $0x90] sm:$0xff] }
  0x38   :  { %v111_v5 = vld [vmem:[#allocation5 + $0x180] sm:$0xff]  ;;  %v112_v6 = vld [vmem:[#allocation5 + $0x188] sm:$0xff]  ;;  %v651_v7 = vpack.c.bf16 %v64_v4, %v63_v2  ;;  %v82_v13 = vld [vmem:[#allocation5 + $0x98] sm:$0xff] }
  0x39   :  { %v681_v8 = vpack.c.bf16 %v112_v6, %v111_v5  ;;  %v95_v9 = vld [vmem:[#allocation5 + $0x100] sm:$0xff]  ;;  %v96_v10 = vld [vmem:[#allocation5 + $0x108] sm:$0xff]  ;;  %650 = vmatprep.subr.bf16.mxu0 %v649_v3  ;;  %v65_v14 = vld [vmem:[#allocation5 + $0x10] sm:$0xff]  ;;  %v653_v16 = vpack.c.bf16 %v82_v13, %v81_v11 }
  0x3a   :  { %v683_v12 = vpack.c.bf16 %v96_v10, %v95_v9  ;;  %v66_v15 = vld [vmem:[#allocation5 + $0x18] sm:$0xff]  ;;  %652 = vmatpush3.bf16.msra.mxu0 %v651_v7  ;;  %v113_v18 = vld [vmem:[#allocation5 + $0x190] sm:$0xff]  ;;  %v83_v23 = vld [vmem:[#allocation5 + $0xa0] sm:$0xff] }
  0x3b   :  { %682 = vmatprep.subr.bf16.mxu1 %v681_v8  ;;  %v655_v17 = vpack.c.bf16 %v66_v15, %v65_v14  ;;  %v114_v19 = vld [vmem:[#allocation5 + $0x198] sm:$0xff]  ;;  %v97_v20 = vld [vmem:[#allocation5 + $0x110] sm:$0xff]  ;;  %v84_v24 = vld [vmem:[#allocation5 + $0xa8] sm:$0xff]  ;;  %654 = vmatprep.subr.bf16.mxu0 %v653_v16 }
  0x3c   :  { %684 = vmatpush3.bf16.msra.mxu1 %v683_v12  ;;  %v685_v21 = vpack.c.bf16 %v114_v19, %v113_v18  ;;  %v98_v22 = vld [vmem:[#allocation5 + $0x118] sm:$0xff]  ;;  %v657_v26 = vpack.c.bf16 %v84_v24, %v83_v23  ;;  %v67_v27 = vld [vmem:[#allocation5 + $0x20] sm:$0xff]  ;;  %v68_v28 = vld [vmem:[#allocation5 + $0x28] sm:$0xff] }
  0x3d   :  { %v687_v25 = vpack.c.bf16 %v98_v22, %v97_v20  ;;  %v115_v29 = vld [vmem:[#allocation5 + $0x1a0] sm:$0xff]  ;;  %v116_v30 = vld [vmem:[#allocation5 + $0x1a8] sm:$0xff]  ;;  %v659_v33 = vpack.c.bf16 %v68_v28, %v67_v27  ;;  %v85_v35 = vld [vmem:[#allocation5 + $0xb0] sm:$0xff] }
  0x3e   :  { %686 = vmatprep.subr.bf16.mxu1 %v685_v21  ;;  %v99_v31 = vld [vmem:[#allocation5 + $0x120] sm:$0xff]  ;;  %v100_v32 = vld [vmem:[#allocation5 + $0x128] sm:$0xff]  ;;  %656 = vmatpush3.bf16.msra.mxu0 %v655_v17  ;;  %v689_v34 = vpack.c.bf16 %v116_v30, %v115_v29  ;;  %v86_v36 = vld [vmem:[#allocation5 + $0xb8] sm:$0xff] }
  0x3f   :  { %v69_v37 = vld [vmem:[#allocation5 + $0x30] sm:$0xff]  ;;  %658 = vmatprep.subr.bf16.mxu0 %v657_v26  ;;  %v691_v38 = vpack.c.bf16 %v100_v32, %v99_v31  ;;  %v661_v39 = vpack.c.bf16 %v86_v36, %v85_v35  ;;  %v70_v40 = vld [vmem:[#allocation5 + $0x38] sm:$0xff]  ;;  %v87_v46 = vld [vmem:[#allocation5 + $0xc0] sm:$0xff] }
  0x40   :  { %688 = vmatpush3.bf16.msra.mxu1 %v687_v25  ;;  %v117_v41 = vld [vmem:[#allocation5 + $0x1b0] sm:$0xff]  ;;  %v118_v42 = vld [vmem:[#allocation5 + $0x1b8] sm:$0xff]  ;;  %v88_v47 = vld [vmem:[#allocation5 + $0xc8] sm:$0xff]  ;;  %v663_v48 = vpack.c.bf16 %v70_v40, %v69_v37 }
  0x41   :  { %690 = vmatprep.subr.bf16.mxu1 %v689_v34  ;;  %v693_v43 = vpack.c.bf16 %v118_v42, %v117_v41  ;;  %v101_v44 = vld [vmem:[#allocation5 + $0x130] sm:$0xff]  ;;  %v102_v45 = vld [vmem:[#allocation5 + $0x138] sm:$0xff]  ;;  %v119_v49 = vld [vmem:[#allocation5 + $0x1c0] sm:$0xff]  ;;  %v665_v52 = vpack.c.bf16 %v88_v47, %v87_v46 }
  0x42   :  { %660 = vmatpush3.bf16.msra.mxu0 %v659_v33  ;;  %v120_v50 = vld [vmem:[#allocation5 + $0x1c8] sm:$0xff]  ;;  %v695_v51 = vpack.c.bf16 %v102_v45, %v101_v44  ;;  %v71_v53 = vld [vmem:[#allocation5 + $0x40] sm:$0xff]  ;;  %v89_v58 = vld [vmem:[#allocation5 + $0xd0] sm:$0xff] }
  0x43   :  { %662 = vmatprep.subr.bf16.mxu0 %v661_v39  ;;  %v72_v54 = vld [vmem:[#allocation5 + $0x48] sm:$0xff]  ;;  %v103_v55 = vld [vmem:[#allocation5 + $0x140] sm:$0xff]  ;;  %v697_v56 = vpack.c.bf16 %v120_v50, %v119_v49  ;;  %v90_v59 = vld [vmem:[#allocation5 + $0xd8] sm:$0xff] }
  0x44   :  { %692 = vmatpush3.bf16.msra.mxu1 %v691_v38  ;;  %v104_v57 = vld [vmem:[#allocation5 + $0x148] sm:$0xff]  ;;  %v121_v60 = vld [vmem:[#allocation5 + $0x1d0] sm:$0xff]  ;;  %v122_v61 = vld [vmem:[#allocation5 + $0x1d8] sm:$0xff]  ;;  %v667_v62 = vpack.c.bf16 %v72_v54, %v71_v53  ;;  %v669_v0 = vpack.c.bf16 %v90_v59, %v89_v58 }
  0x45   :  { %694 = vmatprep.subr.bf16.mxu1 %v693_v43  ;;  %v699_v63 = vpack.c.bf16 %v104_v57, %v103_v55  ;;  %v73_v1 = vld [vmem:[#allocation5 + $0x50] sm:$0xff]  ;;  %v74_v2 = vld [vmem:[#allocation5 + $0x58] sm:$0xff]  ;;  %v701_v4 = vpack.c.bf16 %v122_v61, %v121_v60  ;;  %v91_v6 = vld [vmem:[#allocation5 + $0xe0] sm:$0xff] }
  0x46   :  { %664 = vmatpush3.bf16.msra.mxu0 %v663_v48  ;;  %v105_v3 = vld [vmem:[#allocation5 + $0x150] sm:$0xff]  ;;  %v106_v5 = vld [vmem:[#allocation5 + $0x158] sm:$0xff]  ;;  %v92_v7 = vld [vmem:[#allocation5 + $0xe8] sm:$0xff]  ;;  %v671_v10 = vpack.c.bf16 %v74_v2, %v73_v1 }
  0x47   :  { %666 = vmatprep.subr.bf16.mxu0 %v665_v52  ;;  %v123_v8 = vld [vmem:[#allocation5 + $0x1e0] sm:$0xff]  ;;  %v124_v9 = vld [vmem:[#allocation5 + $0x1e8] sm:$0xff]  ;;  %v58_v12 = vld [vmem:[#allocation2 + $0x8] sm:$0xff]  ;;  %v703_v13 = vpack.c.bf16 %v106_v5, %v105_v3  ;;  %v673_v14 = vpack.c.bf16 %v92_v7, %v91_v6 }
  0x48   :  { %696 = vmatpush3.bf16.msra.mxu1 %v695_v51  ;;  %v75_v11 = vld [vmem:[#allocation5 + $0x60] sm:$0xff]  ;;  %v76_v15 = vld [vmem:[#allocation5 + $0x68] sm:$0xff]  ;;  %v705_v18 = vpack.c.bf16 %v124_v9, %v123_v8  ;;  %v93_v19 = vld [vmem:[#allocation5 + $0xf0] sm:$0xff]  ;;  %230 = vmatprep.mubr.f32.mxu0 %v58_v12 }
  0x49   :  { %698 = vmatprep.subr.bf16.mxu1 %v697_v56  ;;  %v107_v16 = vld [vmem:[#allocation5 + $0x160] sm:$0xff]  ;;  %v108_v17 = vld [vmem:[#allocation5 + $0x168] sm:$0xff]  ;;  %v94_v20 = vld [vmem:[#allocation5 + $0xf8] sm:$0xff]  ;;  %v675_v24 = vpack.c.bf16 %v76_v15, %v75_v11 }
  0x4a   :  { %668 = vmatpush3.bf16.msra.mxu0 %v667_v62  ;;  %v60_v21 = vld [vmem:[#allocation2 + $0x18] sm:$0xff]  ;;  %v125_v22 = vld [vmem:[#allocation5 + $0x1f0] sm:$0xff]  ;;  %v126_v23 = vld [vmem:[#allocation5 + $0x1f8] sm:$0xff]  ;;  %v707_v25 = vpack.c.bf16 %v108_v17, %v107_v16  ;;  %v677_v26 = vpack.c.bf16 %v94_v20, %v93_v19 }
  0x4b   :  { %670 = vmatprep.subr.bf16.mxu0 %v669_v0  ;;  %300 = vmatprep.mubr.f32.mxu1 %v60_v21  ;;  %v77_v27 = vld [vmem:[#allocation5 + $0x70] sm:$0xff]  ;;  %v78_v28 = vld [vmem:[#allocation5 + $0x78] sm:$0xff]  ;;  %v709_v30 = vpack.c.bf16 %v126_v23, %v125_v22  ;;  %v143_v32 = vld [vmem:[#allocation5 + $0x280] sm:$0xff] }
  0x4c   :  { %700 = vmatpush3.bf16.msra.mxu1 %v699_v63  ;;  %v109_v29 = vld [vmem:[#allocation5 + $0x170] sm:$0xff]  ;;  %v110_v31 = vld [vmem:[#allocation5 + $0x178] sm:$0xff]  ;;  %v144_v33 = vld [vmem:[#allocation5 + $0x288] sm:$0xff]  ;;  %v679_v34 = vpack.c.bf16 %v78_v28, %v77_v27 }
  0x4d   :  { %702 = vmatprep.subr.bf16.mxu1 %v701_v4  ;;  %v711_v35 = vpack.c.bf16 %v110_v31, %v109_v29  ;;  %v713_v36 = vpack.c.bf16 %v144_v33, %v143_v32  ;;  %v127_v37 = vld [vmem:[#allocation5 + $0x200] sm:$0xff]  ;;  %v128_v38 = vld [vmem:[#allocation5 + $0x208] sm:$0xff]  ;;  %v145_v39 = vld [vmem:[#allocation5 + $0x290] sm:$0xff] }
  0x4e   :  { %672 = vmatpush3.bf16.msra.mxu0 %v671_v10  ;;  %v146_v40 = vld [vmem:[#allocation5 + $0x298] sm:$0xff]  ;;  %v57_v41 = vld [vmem:[#allocation2] sm:$0xff]  ;;  %v715_v42 = vpack.c.bf16 %v128_v38, %v127_v37  ;;  %v59_v43 = vld [vmem:[#allocation2 + $0x10] sm:$0xff] }
  0x4f   :  { %674 = vmatprep.subr.bf16.mxu0 %v673_v14  ;;  %v717_v44 = vpack.c.bf16 %v146_v40, %v145_v39  ;;  %v129_v45 = vld [vmem:[#allocation5 + $0x210] sm:$0xff]  ;;  %v130_v46 = vld [vmem:[#allocation5 + $0x218] sm:$0xff]  ;;  %v147_v47 = vld [vmem:[#allocation5 + $0x2a0] sm:$0xff] }
  0x50   :  { %704 = vmatpush3.bf16.msra.mxu1 %v703_v13  ;;  %v148_v48 = vld [vmem:[#allocation5 + $0x2a8] sm:$0xff]  ;;  %v62_v49 = vld [vmem:[#allocation2 + $0x28] sm:$0xff]  ;;  %v719_v50 = vpack.c.bf16 %v130_v46, %v129_v45  ;;  %v131_v52 = vld [vmem:[#allocation5 + $0x220] sm:$0xff] }
  0x51   :  { %706 = vmatprep.subr.bf16.mxu1 %v705_v18  ;;  %v721_v51 = vpack.c.bf16 %v148_v48, %v147_v47  ;;  %v132_v53 = vld [vmem:[#allocation5 + $0x228] sm:$0xff]  ;;  %v149_v54 = vld [vmem:[#allocation5 + $0x2b0] sm:$0xff]  ;;  %v150_v55 = vld [vmem:[#allocation5 + $0x2b8] sm:$0xff] }
  0x52   :  { %676 = vmatpush3.bf16.msra.mxu0 %v675_v24  ;;  %v723_v56 = vpack.c.bf16 %v132_v53, %v131_v52  ;;  %v725_v57 = vpack.c.bf16 %v150_v55, %v149_v54  ;;  %v133_v58 = vld [vmem:[#allocation5 + $0x230] sm:$0xff]  ;;  %v134_v59 = vld [vmem:[#allocation5 + $0x238] sm:$0xff]  ;;  %v151_v60 = vld [vmem:[#allocation5 + $0x2c0] sm:$0xff] }
  0x53   :  { %678 = vmatprep.subr.bf16.mxu0 %v677_v26  ;;  %v152_v61 = vld [vmem:[#allocation5 + $0x2c8] sm:$0xff]  ;;  %v727_v62 = vpack.c.bf16 %v134_v59, %v133_v58  ;;  %v135_v0 = vld [vmem:[#allocation5 + $0x240] sm:$0xff]  ;;  %v153_v2 = vld [vmem:[#allocation5 + $0x2d0] sm:$0xff] }
  0x54   :  { %708 = vmatpush3.bf16.msra.mxu1 %v707_v25  ;;  %v729_v63 = vpack.c.bf16 %v152_v61, %v151_v60  ;;  %v136_v1 = vld [vmem:[#allocation5 + $0x248] sm:$0xff]  ;;  %v154_v3 = vld [vmem:[#allocation5 + $0x2d8] sm:$0xff]  ;;  %v137_v6 = vld [vmem:[#allocation5 + $0x250] sm:$0xff]  ;;  %v883_v25 = vmov 0.0|0.0  }
  0x55   :  { %710 = vmatprep.subr.bf16.mxu1 %v709_v30  ;;  %v731_v4 = vpack.c.bf16 %v136_v1, %v135_v0  ;;  %v733_v5 = vpack.c.bf16 %v154_v3, %v153_v2  ;;  %v138_v7 = vld [vmem:[#allocation5 + $0x258] sm:$0xff]  ;;  %v155_v8 = vld [vmem:[#allocation5 + $0x2e0] sm:$0xff]  ;;  %v156_v9 = vld [vmem:[#allocation5 + $0x2e8] sm:$0xff] }
  0x56   :  { %680 = vmatpush3.bf16.msra.mxu0 %v679_v34  ;;  %v735_v10 = vpack.c.bf16 %v138_v7, %v137_v6  ;;  %v737_v11 = vpack.c.bf16 %v156_v9, %v155_v8  ;;  %v139_v12 = vld [vmem:[#allocation5 + $0x260] sm:$0xff]  ;;  %v140_v13 = vld [vmem:[#allocation5 + $0x268] sm:$0xff]  ;;  %v157_v14 = vld [vmem:[#allocation5 + $0x2f0] sm:$0xff] }
  0x57   :  { %714 = vmatprep.subr.bf16.mxu0 %v713_v36  ;;  %v158_v15 = vld [vmem:[#allocation5 + $0x2f8] sm:$0xff]  ;;  %v739_v16 = vpack.c.bf16 %v140_v13, %v139_v12  ;;  %v141_v18 = vld [vmem:[#allocation5 + $0x270] sm:$0xff]  ;;  %v382_v22 = vld [vmem:[#allocation7] sm:$0xff] }
  0x58   :  { %712 = vmatpush3.bf16.msra.mxu1 %v711_v35  ;;  %v741_v17 = vpack.c.bf16 %v158_v15, %v157_v14  ;;  %v142_v19 = vld [vmem:[#allocation5 + $0x278] sm:$0xff]  ;;  %v61_v21 = vld [vmem:[#allocation2 + $0x20] sm:$0xff]  ;;  %v383_v23 = vld [vmem:[#allocation7 + $0x8] sm:$0xff] }
  0x59   :  { %231 = vmatmul.mubr.f32.vlgmr.msra.gmra.mrb[0].mxu0 %v57_v41  ;;  %v743_v20 = vpack.c.bf16 %v142_v19, %v141_v18  ;;  %v384_v24 = vld [vmem:[#allocation7 + $0x10] sm:$0xff]  ;;  %745 = vmatprep.subr.bf16.mxu1 %v883_v25  ;;  %v746_v26 = vpack.c.bf16 %v383_v23, %v382_v22  ;;  %v385_v27 = vld [vmem:[#allocation7 + $0x18] sm:$0xff]  ;;  %v386_v29 = vld [vmem:[#allocation7 + $0x20] sm:$0xff] }
  0x5a   :  { %716 = vmatpush3.bf16.msra.mxu0 %v715_v42  ;;  %370 = vmatprep.mubr.f32.mxu0 %v62_v49  ;;  %v749_v28 = vpack.c.bf16 %v385_v27, %v384_v24  ;;  %v387_v30 = vld [vmem:[#allocation7 + $0x28] sm:$0xff]  ;;  %v388_v32 = vld [vmem:[#allocation7 + $0x30] sm:$0xff]  ;;  %v389_v33 = vld [vmem:[#allocation7 + $0x38] sm:$0xff] }
  0x5b   :  { %301 = vmatmul.mubr.f32.vlgmr.msra.gmra.mrb[0].mxu1 %v59_v43  ;;  %718 = vmatprep.subr.bf16.mxu0 %v717_v44  ;;  %v752_v31 = vpack.c.bf16 %v387_v30, %v386_v29  ;;  %v755_v34 = vpack.c.bf16 %v389_v33, %v388_v32  ;;  %v491_v36 = vld [vmem:[%s971_s2] ss:$0 sm:$0xff]  ;;  %v390_v49 = vld [vmem:[#allocation7 + $0x40] sm:$0xff]  ;;  %v393_v53 = vld [vmem:[#allocation7 + $0x58] sm:$0xff]  ;;  %s886_s2 = smov [#allocation8]  }
  0x5c   :  { %747 = vmatpush3.bf16.msra.mxu1 %v746_v26  ;;  %v392_v52 = vld [vmem:[#allocation7 + $0x50] sm:$0xff]  ;;  %v394_v55 = vld [vmem:[#allocation7 + $0x60] sm:$0xff]  ;;  %v397_v60 = vld [vmem:[#allocation7 + $0x78] sm:$0xff]  ;;  %s481_s26 = sshll.u32 %s886_s2, 4  ;;  %s482_s26 = int_to_ptr.vmem [resolvable:$true] %s481_s26 }
  0x5d   :  { %748 = vmatprep.subr.bf16.mxu1 %v883_v25  ;;  %v761_v54 = vpack.c.bf16 %v393_v53, %v392_v52  ;;  %v396_v59 = vld [vmem:[#allocation7 + $0x70] sm:$0xff]  ;;  %s850_s27 = scalar_lea.vmem %s482_s26, 128  ;;  %p855_p11 = scmp.lt.s32.totalorder %s482_s26, %s482_s26 }
  0x5e   :  { %720 = vmatpush3.bf16.msra.mxu0 %v719_v50  ;;  %v391_v50 = vld [vmem:[#allocation7 + $0x48] sm:$0xff]  ;;  %v767_v61 = vpack.c.bf16 %v397_v60, %v396_v59  ;;  %p851_p10 = scmp.ne.s32.totalorder %s482_s26, %s850_s27  ;;  %p856_p12 = scmp.lt.s32.totalorder %s850_s27, %s850_s27 }
  0x5f   :  { %722 = vmatprep.subr.bf16.mxu0 %v721_v51  ;;  %v758_v51 = vpack.c.bf16 %v391_v50, %v390_v49 }
  0x60   :  { %750 = vmatpush3.bf16.msra.mxu1 %v749_v28  ;;  %p857_p13 = por %p856_p12, %p855_p11 }
  0x61   :  { %751 = vmatprep.subr.bf16.mxu1 %v883_v25 }
  0x62   :  { %724 = vmatpush3.bf16.msra.mxu0 %v723_v56  ;;  %v395_v56 = vld [vmem:[#allocation7 + $0x68] sm:$0xff]  ;;  %p858_p0 = pnand %p857_p13, %p851_p10 }
  0x63   :  { %726 = vmatprep.subr.bf16.mxu0 %v725_v57  ;;  %v885_v57 = vmov 0.0   ;;  %v764_v58 = vpack.c.bf16 %v395_v56, %v394_v55 }
  0x64   :  { %753 = vmatpush3.bf16.msra.mxu1 %v752_v31  ;;  %646 = vmatprep.mubr.msk.f32.mxu1 %vm884_vm0, %v885_v57 }
  0x65   :  { %754 = vmatprep.subr.bf16.mxu1 %v883_v25 }
  0x66   :  { %728 = vmatpush3.bf16.msra.mxu0 %v727_v62 }
  0x67   :  { %730 = vmatprep.subr.bf16.mxu0 %v729_v63 }
  0x68   :  { %756 = vmatpush3.bf16.msra.mxu1 %v755_v34 }
  0x69   :  { %757 = vmatprep.subr.bf16.mxu1 %v883_v25 }
  0x6a   :  { %732 = vmatpush3.bf16.msra.mxu0 %v731_v4 }
  0x6b   :  { %734 = vmatprep.subr.bf16.mxu0 %v733_v5 }
  0x6c   :  { %759 = vmatpush3.bf16.msra.mxu1 %v758_v51 }
  0x6d   :  { %760 = vmatprep.subr.bf16.mxu1 %v883_v25 }
  0x6e   :  { %736 = vmatpush3.bf16.msra.mxu0 %v735_v10 }
  0x6f   :  { %738 = vmatprep.subr.bf16.mxu0 %v737_v11 }
  0x70   :  { %762 = vmatpush3.bf16.msra.mxu1 %v761_v54 }
  0x71   :  { %763 = vmatprep.subr.bf16.mxu1 %v883_v25 }
  0x72   :  { %740 = vmatpush3.bf16.msra.mxu0 %v739_v16 }
  0x73   :  { %742 = vmatprep.subr.bf16.mxu0 %v741_v17 }
  0x74   :  { %765 = vmatpush3.bf16.msra.mxu1 %v764_v58 }
  0x75   :  { %766 = vmatprep.subr.bf16.mxu1 %v883_v25 }
  0x76   :  { %744 = vmatpush3.bf16.msra.mxu0 %v743_v20 }
  0x78   :  { %768 = vmatpush3.bf16.msra.mxu1 %v767_v61 }
  0x79   :  { %371 = vmatmul.mubr.f32.vlgmr.msra.gmra.mrb[2].mxu0 %v61_v21 }
 0x12c   :  { %v524_v35 = vpop.f32.mrb[0].mxu0 }
 0x12d   :  { %v525_v37 = vpop.f32.mrb[1].mxu0 }
 0x12e   :  { %v559_v38 = vpop.f32.mrb[0].mxu1  ;;  %v526_v39 = vadd.f32 %v525_v37, %v524_v35 }
 0x12f   :  { %v560_v40 = vpop.f32.mrb[1].mxu1 }
 0x130   :  { %v561_v41 = vadd.f32 %v560_v40, %v559_v38  ;;  %v233_v42 = vadd.f32 %v526_v39, %v491_v36 }
 0x132   :  { %v303_v43 = vadd.f32 %v561_v41, %v233_v42 }
 0x14c   :  { %v594_v44 = vpop.f32.mrb[2].mxu0 }
 0x14d   :  { %v595_v45 = vpop.f32.mrb[3].mxu0 }
 0x14e   :  { %v596_v46 = vadd.f32 %v595_v45, %v594_v44 }
 0x150   :  { %v373_v47 = vadd.f32 %v596_v46, %v303_v43 }
 0x152   :  { %v376_v48 = vmul.f32 %v373_v47, %v373_v47 }
 0x154   :  { %377 = vadd.xlane.f32.xlu0 %v376_v48 }
 0x1e1   :  { %v378_v62 = vpop.xlane.xlu0 %377 }
 0x1e2   :  { %v379_v63 = vadd.f32 1e-12, %v378_v62 }
 0x1e4   :  { %778 = vrsqrt.f32 %v379_v63 }
 0x1ee   :  { %v779_v0 = vpop.eup %778 }
 0x1ef   :  { %v381_v1 = vmul.f32 %v779_v0, %v373_v47 }
 0x1f1   :  { %647 = vmatmul.mubr.f32.vlgmr.msra.gmra.mrb[2].mxu1 %v381_v1 }
 0x2c4   :  { %v464_v2 = vpop.f32.mrb[2].mxu1 }
 0x2c5   :  { %v468_v3 = vsub.f32 0.0, %v464_v2  ;;  %v648_v4 = vpop.f32.mrb[3].mxu1 }
 0x2c7   :  { %v469_v5 = vmul.f32 1.442695, %v468_v3 }
 0x2c9   :  { %780 = vpow2.f32 %v469_v5 }
 0x2d3   :  { %v781_v6 = vpop.eup %780 }
 0x2d4   :  { %v471_v7 = vadd.f32 1.0, %v781_v6 }
 0x2d6   :  { %782 = vrcp.f32 %v471_v7 }
 0x2e0   :  { %v783_v8 = vpop.eup %782 }
 0x2e1   :  { %474 = vst [vmem:[#allocation8] sm:$0xff] %v783_v8 }
 0x2e2   :  { %861 = shalt.err (!%p858_p0)
}
 0x2e3   :  { %s862_s30 = scalar_lea.hbm %s973_s4, 128 }
 0x2e4   :  { %p863_p1 = scmp.ne.s32.totalorder %s973_s4, %s862_s30  ;;  %p866_p2 = scmp.lt.u32.totalorder %s862_s30, %s973_s4 }
 0x2e6   :  { %p868_p3 = pnand %p866_p2, %p863_p1 }
 0x2e8   :  { %871 = shalt.err (!%p868_p3)
}
 0x2e9   :  { %484 = dma.vmem_to_hbm [thread:$0]  %s482_s26, 128, %s973_s4, [#allocation4]  }
 0x2ea   :  { %876 = dma.done.wait [#allocation4], 128  }
 0x2eb   :  { %877 = vsyncadd [#allocation4], 4294967168 }
 0x2ec   :  { %488 = vsyncpa [#allocation3], 1 }
 0x2ed   :  { %489 = vsyncpa [#allocation6], 1 }
 0x2ee   :  { %490 = vsyncpa [#allocation4], 1 }

</bundles_post_ra>
